<compile_context>
chip_gen: v5e
topology: v5e:2x2
jax: 0.10.0
libtpu: 0.0.40
codegen_flags: <defaults>
</compile_context>

<pallas_src>
import functools

import jax
import jax.numpy as jnp
from jax.experimental import pallas as pl
from jax.experimental.pallas import tpu as pltpu

LANE = 128     # vreg lane width (last dim)
SUBLANE = 8    # f32 sublane count (second-to-last dim)


def _round_up(n, m):
    return ((n + m - 1) // m) * m


def mlp_kernel(x_ref, w1_ref, b1_ref, w2_ref, b2_ref, w3_ref, b3_ref, o_ref):
    # Layer 1: Linear + ReLU (MXU matmul, f32 accumulation)
    h1 = jnp.dot(x_ref[...], w1_ref[...], preferred_element_type=jnp.float32)
    h1 = jnp.maximum(h1 + b1_ref[...], 0.0)
    # Layer 2: Linear + ReLU
    h2 = jnp.dot(h1, w2_ref[...], preferred_element_type=jnp.float32)
    h2 = jnp.maximum(h2 + b2_ref[...], 0.0)
    # Layer 3: Linear (logits, no activation)
    out = jnp.dot(h2, w3_ref[...], preferred_element_type=jnp.float32)
    o_ref[...] = (out + b3_ref[...]).astype(o_ref.dtype)


@functools.partial(jax.jit, static_argnames=("block_batch",))
def neural_net_forward(x, w1, b1, w2, b2, w3, b3, *, block_batch=512):
    """3-layer MLP forward, batch-tiled Pallas kernel with VMEM-resident weights."""
    batch, input_size = x.shape
    hidden = w1.shape[1]
    num_classes = w3.shape[1]
    f32 = jnp.float32

    # --- Pad feature dims to 128 lanes (lane-dense loads/stores, no masked vst). ---
    in_p = _round_up(input_size, LANE)
    hid_p = _round_up(hidden, LANE)
    cls_p = _round_up(num_classes, LANE)

    # --- Pick the batch tile: multiple of 8 sublanes, capped by a conservative
    #     VMEM budget (sized for v7x's smaller scoped VMEM, with double-buffering). ---
    vmem_budget = 16 * 1024 * 1024  # bytes of VMEM we allow the tiles to occupy
    weight_bytes = (in_p * hid_p + hid_p * hid_p + hid_p * cls_p + 2 * hid_p + cls_p) * 4
    act_row_bytes = 2 * 4 * (in_p + cls_p)  # double-buffered x tile + output tile, per row
    max_rows = max(SUBLANE, ((vmem_budget - weight_bytes) // act_row_bytes) // SUBLANE * SUBLANE)
    tb = min(_round_up(batch, SUBLANE), _round_up(block_batch, SUBLANE), max_rows)
    batch_p = _round_up(batch, tb)

    # --- Zero-pad operands (padding contributes exact zeros through every layer). ---
    xp = jnp.zeros((batch_p, in_p), f32).at[:batch, :input_size].set(x.astype(f32))
    w1p = jnp.zeros((in_p, hid_p), f32).at[:input_size, :hidden].set(w1.astype(f32))
    b1p = jnp.zeros((1, hid_p), f32).at[:, :hidden].set(b1.reshape(1, -1).astype(f32))
    w2p = jnp.zeros((hid_p, hid_p), f32).at[:hidden, :hidden].set(w2.astype(f32))
    b2p = jnp.zeros((1, hid_p), f32).at[:, :hidden].set(b2.reshape(1, -1).astype(f32))
    w3p = jnp.zeros((hid_p, cls_p), f32).at[:hidden, :num_classes].set(w3.astype(f32))
    b3p = jnp.zeros((1, cls_p), f32).at[:, :num_classes].set(b3.reshape(1, -1).astype(f32))

    grid = (batch_p // tb,)
    out = pl.pallas_call(
        mlp_kernel,
        out_shape=jax.ShapeDtypeStruct((batch_p, cls_p), f32),
        grid_spec=pltpu.PrefetchScalarGridSpec(
            num_scalar_prefetch=0,
            grid=grid,
            in_specs=[
                # Activations: streamed per batch tile.
                pl.BlockSpec((tb, in_p), lambda i: (i, 0)),
                # Weights / biases: full blocks, constant index_map -> stay resident in VMEM.
                pl.BlockSpec((in_p, hid_p), lambda i: (0, 0)),
                pl.BlockSpec((1, hid_p), lambda i: (0, 0)),
                pl.BlockSpec((hid_p, hid_p), lambda i: (0, 0)),
                pl.BlockSpec((1, hid_p), lambda i: (0, 0)),
                pl.BlockSpec((hid_p, cls_p), lambda i: (0, 0)),
                pl.BlockSpec((1, cls_p), lambda i: (0, 0)),
            ],
            out_specs=pl.BlockSpec((tb, cls_p), lambda i: (i, 0)),
        ),
        compiler_params=pltpu.CompilerParams(
            # Batch tiles are independent -> shard across v7x's 2 TensorCores.
            dimension_semantics=("parallel",),
        ),
    )(xp, w1p, b1p, w2p, b2p, w3p, b3p)

    # Slice away batch / class padding.
    return out[:batch, :num_classes]


def init_params(key, input_size, hidden_size, num_classes):
    """Deterministic parameter init mimicking torch.nn.Linear's U(-1/sqrt(fan_in), +1/sqrt(fan_in))."""
    ks = jax.random.split(key, 6)

    def uniform(k, shape, fan_in):
        bound = 1.0 / jnp.sqrt(jnp.float32(fan_in))
        return jax.random.uniform(k, shape, jnp.float32, -bound, bound)

    # Weights are (in_features, out_features) — transposed vs PyTorch storage.
    w1 = uniform(ks[0], (input_size, hidden_size), input_size)
    b1 = uniform(ks[1], (1, hidden_size), input_size)
    w2 = uniform(ks[2], (hidden_size, hidden_size), hidden_size)
    b2 = uniform(ks[3], (1, hidden_size), hidden_size)
    w3 = uniform(ks[4], (hidden_size, num_classes), hidden_size)
    b3 = uniform(ks[5], (1, num_classes), hidden_size)
    return w1, b1, w2, b2, w3, b3


if __name__ == "__main__":
    # Small shapes consistent with the module: bag-of-words input, hidden_size=8.
    batch = 4
    input_size = 32      # stand-in for len(X_train[0])
    hidden_size = 8      # as in chatbot.py
    num_classes = 6      # stand-in for number of intent tags

    key = jax.random.PRNGKey(0)
    k_x, k_p = jax.random.split(key)
    x = jax.random.uniform(k_x, (batch, input_size), jnp.float32)  # bag-of-words-like input
    params = init_params(k_p, input_size, hidden_size, num_classes)

    out = neural_net_forward(x, *params)
    jax.block_until_ready(out)

    # Sanity check against a plain-JAX reference of the same forward pass.
    w1, b1, w2, b2, w3, b3 = params
    ref = jnp.maximum(x @ w1 + b1, 0.0)
    ref = jnp.maximum(ref @ w2 + b2, 0.0)
    ref = ref @ w3 + b3
    assert out.shape == (batch, num_classes)
    assert jnp.allclose(out, ref, atol=1e-4, rtol=1e-4)

    print("KERNEL_OK")
</pallas_src>

<mosaic_0001>
module attributes {stable_mosaic.version = 11 : i64} {
  func.func @mlp_kernel(%arg0: i32, %arg1: memref<8x128xf32, #tpu.memory_space<vmem>>, %arg2: memref<128x128xf32, #tpu.memory_space<vmem>>, %arg3: memref<1x128xf32, #tpu.memory_space<vmem>>, %arg4: memref<128x128xf32, #tpu.memory_space<vmem>>, %arg5: memref<1x128xf32, #tpu.memory_space<vmem>>, %arg6: memref<128x128xf32, #tpu.memory_space<vmem>>, %arg7: memref<1x128xf32, #tpu.memory_space<vmem>>, %arg8: memref<8x128xf32, #tpu.memory_space<vmem>>) attributes {dimension_semantics = [#tpu.dimension_semantics<parallel>], iteration_bounds = array<i64: 1>, scalar_prefetch = 0 : i64, scratch_operands = 0 : i64, tpu.core_type = #tpu.core_type<tc>, window_params = [{transform_indices = @transform_0, window_bounds = array<i64: 8, 128>}, {pipeline_mode = #tpu.pipeline_mode<synchronous>, transform_indices = @transform_1, window_bounds = array<i64: 128, 128>}, {pipeline_mode = #tpu.pipeline_mode<synchronous>, transform_indices = @transform_2, window_bounds = array<i64: 1, 128>}, {pipeline_mode = #tpu.pipeline_mode<synchronous>, transform_indices = @transform_3, window_bounds = array<i64: 128, 128>}, {pipeline_mode = #tpu.pipeline_mode<synchronous>, transform_indices = @transform_4, window_bounds = array<i64: 1, 128>}, {pipeline_mode = #tpu.pipeline_mode<synchronous>, transform_indices = @transform_5, window_bounds = array<i64: 128, 128>}, {pipeline_mode = #tpu.pipeline_mode<synchronous>, transform_indices = @transform_6, window_bounds = array<i64: 1, 128>}, {transform_indices = @transform_7, window_bounds = array<i64: 8, 128>}]} {
    %c0 = arith.constant 0 : index
    %c0_0 = arith.constant 0 : index
    %0 = vector.load %arg1[%c0, %c0_0] : memref<8x128xf32, #tpu.memory_space<vmem>>, vector<8x128xf32>
    %c0_1 = arith.constant 0 : index
    %c0_2 = arith.constant 0 : index
    %1 = vector.load %arg2[%c0_1, %c0_2] : memref<128x128xf32, #tpu.memory_space<vmem>>, vector<128x128xf32>
    %cst = arith.constant dense<0.000000e+00> : vector<8x128xf32>
    %2 = tpu.matmul %0, %1, %cst {dimension_numbers = #tpu.dot_dimension_numbers<[1], [0], [0], [1], [0, 0, 1, 1], [], []>} : vector<8x128xf32>, vector<128x128xf32>, vector<8x128xf32> -> vector<8x128xf32>
    %c0_3 = arith.constant 0 : index
    %c0_4 = arith.constant 0 : index
    %3 = vector.load %arg3[%c0_3, %c0_4] : memref<1x128xf32, #tpu.memory_space<vmem>>, vector<1x128xf32>
    %4 = vector.broadcast %3 : vector<1x128xf32> to vector<8x128xf32>
    %5 = arith.addf %2, %4 : vector<8x128xf32>
    %cst_5 = arith.constant 0.000000e+00 : f32
    %6 = vector.broadcast %cst_5 : f32 to vector<8x128xf32>
    %7 = arith.maximumf %5, %6 : vector<8x128xf32>
    %c0_6 = arith.constant 0 : index
    %c0_7 = arith.constant 0 : index
    %8 = vector.load %arg4[%c0_6, %c0_7] : memref<128x128xf32, #tpu.memory_space<vmem>>, vector<128x128xf32>
    %cst_8 = arith.constant dense<0.000000e+00> : vector<8x128xf32>
    %9 = tpu.matmul %7, %8, %cst_8 {dimension_numbers = #tpu.dot_dimension_numbers<[1], [0], [0], [1], [0, 0, 1, 1], [], []>} : vector<8x128xf32>, vector<128x128xf32>, vector<8x128xf32> -> vector<8x128xf32>
    %c0_9 = arith.constant 0 : index
    %c0_10 = arith.constant 0 : index
    %10 = vector.load %arg5[%c0_9, %c0_10] : memref<1x128xf32, #tpu.memory_space<vmem>>, vector<1x128xf32>
    %11 = vector.broadcast %10 : vector<1x128xf32> to vector<8x128xf32>
    %12 = arith.addf %9, %11 : vector<8x128xf32>
    %cst_11 = arith.constant 0.000000e+00 : f32
    %13 = vector.broadcast %cst_11 : f32 to vector<8x128xf32>
    %14 = arith.maximumf %12, %13 : vector<8x128xf32>
    %c0_12 = arith.constant 0 : index
    %c0_13 = arith.constant 0 : index
    %15 = vector.load %arg6[%c0_12, %c0_13] : memref<128x128xf32, #tpu.memory_space<vmem>>, vector<128x128xf32>
    %cst_14 = arith.constant dense<0.000000e+00> : vector<8x128xf32>
    %16 = tpu.matmul %14, %15, %cst_14 {dimension_numbers = #tpu.dot_dimension_numbers<[1], [0], [0], [1], [0, 0, 1, 1], [], []>} : vector<8x128xf32>, vector<128x128xf32>, vector<8x128xf32> -> vector<8x128xf32>
    %c0_15 = arith.constant 0 : index
    %c0_16 = arith.constant 0 : index
    %17 = vector.load %arg7[%c0_15, %c0_16] : memref<1x128xf32, #tpu.memory_space<vmem>>, vector<1x128xf32>
    %18 = vector.broadcast %17 : vector<1x128xf32> to vector<8x128xf32>
    %19 = arith.addf %16, %18 : vector<8x128xf32>
    %c0_17 = arith.constant 0 : index
    %c0_18 = arith.constant 0 : index
    %20 = vector.load %arg8[%c0_17, %c0_18] : memref<8x128xf32, #tpu.memory_space<vmem>>, vector<8x128xf32>
    tpu.vector_store %arg8[%c0_17, %c0_18], %19 {strides = array<i32>} : memref<8x128xf32, #tpu.memory_space<vmem>>, vector<8x128xf32>,
    return
  }
  func.func @transform_0(%arg0: i32) -> (i32, i32) {
    %c0_i32 = arith.constant 0 : i32
    %c0_i32_0 = arith.constant 0 : i32
    return %arg0, %c0_i32 : i32, i32
  }
  func.func @transform_1(%arg0: i32) -> (i32, i32) {
    %c0_i32 = arith.constant 0 : i32
    %c0_i32_0 = arith.constant 0 : i32
    %c0_i32_1 = arith.constant 0 : i32
    return %c0_i32, %c0_i32_0 : i32, i32
  }
  func.func @transform_2(%arg0: i32) -> (i32, i32) {
    %c0_i32 = arith.constant 0 : i32
    %c0_i32_0 = arith.constant 0 : i32
    %c0_i32_1 = arith.constant 0 : i32
    return %c0_i32, %c0_i32_0 : i32, i32
  }
  func.func @transform_3(%arg0: i32) -> (i32, i32) {
    %c0_i32 = arith.constant 0 : i32
    %c0_i32_0 = arith.constant 0 : i32
    %c0_i32_1 = arith.constant 0 : i32
    return %c0_i32, %c0_i32_0 : i32, i32
  }
  func.func @transform_4(%arg0: i32) -> (i32, i32) {
    %c0_i32 = arith.constant 0 : i32
    %c0_i32_0 = arith.constant 0 : i32
    %c0_i32_1 = arith.constant 0 : i32
    return %c0_i32, %c0_i32_0 : i32, i32
  }
  func.func @transform_5(%arg0: i32) -> (i32, i32) {
    %c0_i32 = arith.constant 0 : i32
    %c0_i32_0 = arith.constant 0 : i32
    %c0_i32_1 = arith.constant 0 : i32
    return %c0_i32, %c0_i32_0 : i32, i32
  }
  func.func @transform_6(%arg0: i32) -> (i32, i32) {
    %c0_i32 = arith.constant 0 : i32
    %c0_i32_0 = arith.constant 0 : i32
    %c0_i32_1 = arith.constant 0 : i32
    return %c0_i32, %c0_i32_0 : i32, i32
  }
  func.func @transform_7(%arg0: i32) -> (i32, i32) {
    %c0_i32 = arith.constant 0 : i32
    %c0_i32_0 = arith.constant 0 : i32
    return %arg0, %c0_i32 : i32, i32
  }
}

</mosaic_0001>

<bundles_post_ra>
// kernel: neural_net_forward.1
= control target key start
LH: loop header
LB: loop body
LE: loop exit
PB: predicated region body
PF: predicated region fallthrough
CT: control target
= control target key end

     0   :  { %s356_s1 = inlined_call_operand.vmem [shape: f32[128,128], index: 1, kind: input, shape index: {}]   ;;  %s357_s3 = inlined_call_operand.vmem [shape: f32[128,128], index: 3, kind: input, shape index: {}]   ;;  %s358_s2 = inlined_call_operand.vmem [shape: f32[1,128], index: 2, kind: input, shape index: {}]   ;;  %s359_s0 = inlined_call_operand.vmem [shape: f32[8,128], index: 0, kind: input, shape index: {}]   ;;  %s360_s4 = inlined_call_operand.vmem [shape: f32[1,128], index: 4, kind: input, shape index: {}]   ;;  %s361_s5 = inlined_call_operand.vmem [shape: f32[128,128], index: 5, kind: input, shape index: {}]   ;;  %s362_s6 = inlined_call_operand.vmem [shape: f32[1,128], index: 6, kind: input, shape index: {}]   ;;  %s363_s7 = inlined_call_operand.vmem [shape: f32[8,128], index: 7, kind: output, shape index: {}]  }
   0x1   :  { %v42_v0 = vld [vmem:[%s356_s1 + $0x78] sm:$0xff]  ;;  %v41_v1 = vld [vmem:[%s356_s1 + $0x70] sm:$0xff]  ;;  %v40_v2 = vld [vmem:[%s356_s1 + $0x68] sm:$0xff] }
   0x2   :  { %47 = vmatpush.msra.mxu0 %v42_v0  ;;  %v39_v3 = vld [vmem:[%s356_s1 + $0x60] sm:$0xff]  ;;  %v83_v4 = vld [vmem:[%s357_s3 + $0x78] sm:$0xff]  ;;  %v82_v6 = vld [vmem:[%s357_s3 + $0x70] sm:$0xff] }
   0x3   :  { %v38_v5 = vld [vmem:[%s356_s1 + $0x58] sm:$0xff]  ;;  %88 = vmatpush.msra.mxu1 %v83_v4  ;;  %v81_v7 = vld [vmem:[%s357_s3 + $0x68] sm:$0xff]  ;;  %v37_v8 = vld [vmem:[%s356_s1 + $0x50] sm:$0xff] }
   0x4   :  { %48 = vmatpush.msra.mxu0 %v41_v1  ;;  %v80_v9 = vld [vmem:[%s357_s3 + $0x60] sm:$0xff]  ;;  %v36_v10 = vld [vmem:[%s356_s1 + $0x48] sm:$0xff]  ;;  %v79_v11 = vld [vmem:[%s357_s3 + $0x58] sm:$0xff] }
   0x5   :  { %89 = vmatpush.msra.mxu1 %v82_v6  ;;  %v35_v12 = vld [vmem:[%s356_s1 + $0x40] sm:$0xff]  ;;  %v78_v13 = vld [vmem:[%s357_s3 + $0x50] sm:$0xff]  ;;  %v34_v14 = vld [vmem:[%s356_s1 + $0x38] sm:$0xff] }
   0x6   :  { %49 = vmatpush.msra.mxu0 %v40_v2  ;;  %v77_v15 = vld [vmem:[%s357_s3 + $0x48] sm:$0xff]  ;;  %v33_v16 = vld [vmem:[%s356_s1 + $0x30] sm:$0xff]  ;;  %v76_v17 = vld [vmem:[%s357_s3 + $0x40] sm:$0xff] }
   0x7   :  { %90 = vmatpush.msra.mxu1 %v81_v7  ;;  %v32_v18 = vld [vmem:[%s356_s1 + $0x28] sm:$0xff]  ;;  %v75_v19 = vld [vmem:[%s357_s3 + $0x38] sm:$0xff]  ;;  %v31_v20 = vld [vmem:[%s356_s1 + $0x20] sm:$0xff] }
   0x8   :  { %50 = vmatpush.msra.mxu0 %v39_v3  ;;  %v74_v21 = vld [vmem:[%s357_s3 + $0x30] sm:$0xff]  ;;  %v30_v22 = vld [vmem:[%s356_s1 + $0x18] sm:$0xff]  ;;  %v73_v23 = vld [vmem:[%s357_s3 + $0x28] sm:$0xff] }
   0x9   :  { %91 = vmatpush.msra.mxu1 %v80_v9  ;;  %v29_v24 = vld [vmem:[%s356_s1 + $0x10] sm:$0xff]  ;;  %v72_v25 = vld [vmem:[%s357_s3 + $0x20] sm:$0xff]  ;;  %v28_v26 = vld [vmem:[%s356_s1 + $0x8] sm:$0xff] }
   0xa   :  { %51 = vmatpush.msra.mxu0 %v38_v5  ;;  %v71_v27 = vld [vmem:[%s357_s3 + $0x18] sm:$0xff]  ;;  %v27_v28 = vld [vmem:[%s356_s1] sm:$0xff]  ;;  %v70_v30 = vld [vmem:[%s357_s3 + $0x10] sm:$0xff] }
   0xb   :  { %92 = vmatpush.msra.mxu1 %v79_v11  ;;  %v26_v29 = vld [vmem:[%s359_s0] sm:$0xff]  ;;  %v69_v31 = vld [vmem:[%s357_s3 + $0x8] sm:$0xff]  ;;  %v124_v33 = vld [vmem:[%s361_s5 + $0x78] sm:$0xff] }
   0xc   :  { %52 = vmatpush.msra.mxu0 %v37_v8  ;;  %v68_v32 = vld [vmem:[%s357_s3] sm:$0xff]  ;;  %v123_v34 = vld [vmem:[%s361_s5 + $0x70] sm:$0xff]  ;;  %129 = vmatpush.msra.mxu2 %v124_v33  ;;  %v122_v35 = vld [vmem:[%s361_s5 + $0x68] sm:$0xff] }
   0xd   :  { %93 = vmatpush.msra.mxu1 %v78_v13  ;;  %v121_v36 = vld [vmem:[%s361_s5 + $0x60] sm:$0xff]  ;;  %v120_v37 = vld [vmem:[%s361_s5 + $0x58] sm:$0xff]  ;;  %v119_v38 = vld [vmem:[%s361_s5 + $0x50] sm:$0xff] }
   0xe   :  { %53 = vmatpush.msra.mxu0 %v36_v10  ;;  %130 = vmatpush.msra.mxu2 %v123_v34  ;;  %v118_v39 = vld [vmem:[%s361_s5 + $0x48] sm:$0xff]  ;;  %v117_v40 = vld [vmem:[%s361_s5 + $0x40] sm:$0xff]  ;;  %v116_v41 = vld [vmem:[%s361_s5 + $0x38] sm:$0xff] }
   0xf   :  { %94 = vmatpush.msra.mxu1 %v77_v15  ;;  %v115_v42 = vld [vmem:[%s361_s5 + $0x30] sm:$0xff]  ;;  %v114_v43 = vld [vmem:[%s361_s5 + $0x28] sm:$0xff]  ;;  %v113_v44 = vld [vmem:[%s361_s5 + $0x20] sm:$0xff] }
  0x10   :  { %54 = vmatpush.msra.mxu0 %v35_v12  ;;  %131 = vmatpush.msra.mxu2 %v122_v35  ;;  %v112_v45 = vld [vmem:[%s361_s5 + $0x18] sm:$0xff]  ;;  %v154_v46 = vld [vmem:[%s358_s2] ss:$0 sm:$0xff]  ;;  %v111_v50 = vld [vmem:[%s361_s5 + $0x10] sm:$0xff] }
  0x11   :  { %95 = vmatpush.msra.mxu1 %v76_v17  ;;  %v110_v51 = vld [vmem:[%s361_s5 + $0x8] sm:$0xff]  ;;  %v109_v52 = vld [vmem:[%s361_s5] sm:$0xff] }
  0x12   :  { %55 = vmatpush.msra.mxu0 %v34_v14  ;;  %132 = vmatpush.msra.mxu2 %v121_v36  ;;  %v155_v53 = vld [vmem:[%s360_s4] ss:$0 sm:$0xff] }
  0x13   :  { %96 = vmatpush.msra.mxu1 %v75_v19  ;;  %v156_v57 = vld [vmem:[%s362_s6] ss:$0 sm:$0xff] }
  0x14   :  { %56 = vmatpush.msra.mxu0 %v33_v16  ;;  %133 = vmatpush.msra.mxu2 %v120_v37 }
  0x15   :  { %97 = vmatpush.msra.mxu1 %v74_v21 }
  0x16   :  { %57 = vmatpush.msra.mxu0 %v32_v18  ;;  %134 = vmatpush.msra.mxu2 %v119_v38 }
  0x17   :  { %98 = vmatpush.msra.mxu1 %v73_v23 }
  0x18   :  { %58 = vmatpush.msra.mxu0 %v31_v20  ;;  %135 = vmatpush.msra.mxu2 %v118_v39 }
  0x19   :  { %99 = vmatpush.msra.mxu1 %v72_v25 }
  0x1a   :  { %59 = vmatpush.msra.mxu0 %v30_v22  ;;  %136 = vmatpush.msra.mxu2 %v117_v40 }
  0x1b   :  { %100 = vmatpush.msra.mxu1 %v71_v27 }
  0x1c   :  { %60 = vmatpush.msra.mxu0 %v29_v24  ;;  %137 = vmatpush.msra.mxu2 %v116_v41 }
  0x1d   :  { %101 = vmatpush.msra.mxu1 %v70_v30 }
  0x1e   :  { %61 = vmatpush.msra.mxu0 %v28_v26  ;;  %138 = vmatpush.msra.mxu2 %v115_v42 }
  0x1f   :  { %102 = vmatpush.msra.mxu1 %v69_v31 }
  0x20   :  { %62 = vmatpush.msra.mxu0 %v27_v28  ;;  %139 = vmatpush.msra.mxu2 %v114_v43 }
  0x21   :  { %63 = vmatmul.f32.vlgmr.msra.gmra.mxu0 %v26_v29  ;;  %103 = vmatpush.msra.mxu1 %v68_v32 }
  0x22   :  { %140 = vmatpush.msra.mxu2 %v113_v44 }
  0x24   :  { %141 = vmatpush.msra.mxu2 %v112_v45 }
  0x26   :  { %142 = vmatpush.msra.mxu2 %v111_v50 }
  0x28   :  { %143 = vmatpush.msra.mxu2 %v110_v51 }
  0x2a   :  { %144 = vmatpush.msra.mxu2 %v109_v52 }
  0x9e   :  { %v64_v47 = vpop.f32.mrf.mxu0 }
  0x9f   :  { %v65_v48 = vadd.f32 %v154_v46, %v64_v47 }
  0xa1   :  { %v67_v49 = vmax.f32 %v65_v48, 0.0 }
  0xa3   :  { %104 = vmatmul.f32.vlgmr.msra.gmra.mxu1 %v67_v49 }
 0x120   :  { %v105_v54 = vpop.f32.mrf.mxu1 }
 0x121   :  { %v106_v55 = vadd.f32 %v155_v53, %v105_v54 }
 0x123   :  { %v108_v56 = vmax.f32 %v106_v55, 0.0 }
 0x125   :  { %145 = vmatmul.f32.vlgmr.msra.gmra.mxu2 %v108_v56 }
 0x1a8   :  { %v146_v58 = vpop.f32.mrf.mxu2 }
 0x1a9   :  { %v147_v59 = vadd.f32 %v156_v57, %v146_v58 }
 0x1ab   :  { %149 = vst [vmem:[%s363_s7] sm:$0xff] %v147_v59 }

</bundles_post_ra>
